<compile_context>
chip_gen: v6e
topology: v6e:2x2x1
jax: 0.10.0
libtpu: 0.0.40
codegen_flags: <defaults>
</compile_context>

<pallas_src>
import functools

import jax
import jax.numpy as jnp
from jax.experimental import pallas as pl
from jax.experimental.pallas import tpu as pltpu


# ---------------------------------------------------------------------------
# VMEM budgeting (generation aware).
# ---------------------------------------------------------------------------
@functools.lru_cache(maxsize=None)
def _vmem_budget():
    try:
        cap = int(pltpu.get_tpu_info().vmem_capacity_bytes)
    except Exception:
        cap = 64 << 20  # conservative default = v7x per-TensorCore VMEM
    scoped = min(cap // 2, 64 << 20)  # scoped VMEM limit we request
    # Per-block budget: 2x double-buffered input blocks + 2x output blocks +
    # in-kernel f32 temporaries -> keep each block at ~scoped/12.
    block_bytes = max(512 << 10, min(scoped // 12, 8 << 20))
    return scoped, block_bytes


def _sublane_multiple(dtype):
    # f32 -> 8-row sublane tiles, bf16 -> 16, int8/fp8 -> 32.
    itemsize = max(1, jnp.dtype(dtype).itemsize)
    return max(8, 32 // itemsize)


# ---------------------------------------------------------------------------
# Kernels (all math in f32; EUP exp + EUP approx reciprocal).
# ---------------------------------------------------------------------------
def _softmax_last_kernel(x_ref, o_ref):
    # Block: (tile_rows, C) -- softmax over the lane (last) axis.
    x = x_ref[...].astype(jnp.float32)
    m = jnp.max(x, axis=-1, keepdims=True)
    e = jnp.exp(x - m)
    s = jnp.sum(e, axis=-1, keepdims=True)
    o_ref[...] = (e * pl.reciprocal(s, approx=True)).astype(o_ref.dtype)


def _softmax_mid_kernel(x_ref, o_ref):
    # Block: (tile_pre, C, tile_post) -- softmax over the middle (sublane)
    # axis; the flattened trailing axis stays dense on lanes.
    x = x_ref[...].astype(jnp.float32)
    m = jnp.max(x, axis=1, keepdims=True)
    e = jnp.exp(x - m)
    s = jnp.sum(e, axis=1, keepdims=True)
    o_ref[...] = (e * pl.reciprocal(s, approx=True)).astype(o_ref.dtype)


# ---------------------------------------------------------------------------
# pallas_call wrappers.
# ---------------------------------------------------------------------------
@functools.partial(jax.jit, static_argnames=("tile_rows", "vmem_limit"))
def _softmax_lastdim(x2d, tile_rows, vmem_limit):
    rows, cols = x2d.shape
    grid = (pl.cdiv(rows, tile_rows),)
    return pl.pallas_call(
        _softmax_last_kernel,
        out_shape=jax.ShapeDtypeStruct((rows, cols), x2d.dtype),
        grid_spec=pltpu.PrefetchScalarGridSpec(
            num_scalar_prefetch=0,
            grid=grid,
            in_specs=[pl.BlockSpec((tile_rows, cols), lambda i: (i, 0))],
            out_specs=pl.BlockSpec((tile_rows, cols), lambda i: (i, 0)),
        ),
        compiler_params=pltpu.CompilerParams(
            dimension_semantics=("parallel",),
            vmem_limit_bytes=vmem_limit,
        ),
    )(x2d)


@functools.partial(jax.jit, static_argnames=("tile_pre", "tile_post", "vmem_limit"))
def _softmax_middim(x3d, tile_pre, tile_post, vmem_limit):
    pre, c, post = x3d.shape
    grid = (pl.cdiv(pre, tile_pre), pl.cdiv(post, tile_post))
    return pl.pallas_call(
        _softmax_mid_kernel,
        out_shape=jax.ShapeDtypeStruct((pre, c, post), x3d.dtype),
        grid_spec=pltpu.PrefetchScalarGridSpec(
            num_scalar_prefetch=0,
            grid=grid,
            in_specs=[pl.BlockSpec((tile_pre, c, tile_post),
                                   lambda i, j: (i, 0, j))],
            out_specs=pl.BlockSpec((tile_pre, c, tile_post),
                                   lambda i, j: (i, 0, j)),
        ),
        compiler_params=pltpu.CompilerParams(
            dimension_semantics=("parallel", "parallel"),
            vmem_limit_bytes=vmem_limit,
        ),
    )(x3d)


# ---------------------------------------------------------------------------
# Public API mirroring torchact.nn.Softmax.
# ---------------------------------------------------------------------------
def _pytorch_default_softmax_dim(ndim):
    # Mirrors torch.nn.functional._get_softmax_dim behavior for dim=None.
    return 0 if ndim in (0, 1, 3) else 1


def softmax(x, dim=None):
    """Pallas-backed equivalent of torchact.nn.Softmax()(x)."""
    x = jnp.asarray(x)
    ndim = x.ndim
    if ndim == 0:
        return jnp.ones_like(x)
    if dim is None:
        dim = _pytorch_default_softmax_dim(ndim)
    dim = dim % ndim

    shape = x.shape
    vmem_limit, block_bytes = _vmem_budget()
    block_elems = max(1024, block_bytes // 4)  # sized in f32 elements

    pre = 1
    for s in shape[:dim]:
        pre *= s
    c = shape[dim]
    post = 1
    for s in shape[dim + 1:]:
        post *= s

    if post == 1:
        # Softmax axis is (effectively) the last axis: reduce over lanes.
        rows, cols = pre, c
        x2d = x.reshape(rows, cols)          # view-only flatten, no transpose
        sub = _sublane_multiple(x.dtype)
        tile_rows = max(sub, (block_elems // max(cols, 1)) // sub * sub)
        if tile_rows >= rows:
            tile_rows = rows                 # full extent is always legal
        out = _softmax_lastdim(x2d, int(tile_rows), int(vmem_limit))
        return out.reshape(shape)

    # Softmax over a middle axis: keep the trailing axis on lanes, no
    # transpose / moveaxis in the wrapper.
    x3d = x.reshape(pre, c, post)            # view-only flatten
    if post % 128 == 0:
        tile_post = max(128, (block_elems // max(c, 1)) // 128 * 128)
        tile_post = min(tile_post, post)
    else:
        # Lane dim must be a multiple of 128 or the full extent.
        tile_post = post
    tile_pre = max(1, min(pre, block_elems // max(c * tile_post, 1)))
    out = _softmax_middim(x3d, int(tile_pre), int(tile_post), int(vmem_limit))
    return out.reshape(shape)


class Softmax:
    """JAX/Pallas mirror of torchact.nn.Softmax (no parameters)."""

    def __init__(self, dim=None):
        self.dim = dim

    def __call__(self, x):
        return softmax(x, dim=self.dim)


if __name__ == "__main__":
    key = jax.random.PRNGKey(0)
    # NCHW-style input, matching the module's intended use.
    x = jax.random.normal(key, (2, 4, 16, 16), dtype=jnp.float32)

    m = Softmax()                      # dim=None -> dim=1 for 4-D (PyTorch rule)
    out = jax.block_until_ready(m(x))

    ref = jax.nn.softmax(x, axis=1)
    assert out.shape == x.shape and out.dtype == x.dtype
    # approx reciprocal (EUP) -> ~1e-4 relative error on the normalisation.
    assert jnp.allclose(out, ref, atol=2e-3, rtol=2e-3)
    assert jnp.allclose(jnp.sum(out, axis=1), 1.0, atol=5e-3)

    # 1-D docstring example (dim=None -> dim=0 for 1-D input).
    v = jnp.array([1.0, -2.0, 0.0, 3.0], dtype=jnp.float32)
    vo = jax.block_until_ready(Softmax()(v))
    assert jnp.allclose(vo, jax.nn.softmax(v), atol=2e-3, rtol=2e-3)

    # Last-axis softmax on a 3-D input exercises the lane-reduce path.
    y = jax.random.normal(jax.random.PRNGKey(1), (2, 8, 32), dtype=jnp.float32)
    yo = jax.block_until_ready(softmax(y, dim=-1))
    assert jnp.allclose(yo, jax.nn.softmax(y, axis=-1), atol=2e-3, rtol=2e-3)

    # Explicit positive-dim middle-axis softmax (exercises the mid path again
    # with a non-default dim).
    z = jax.random.normal(jax.random.PRNGKey(2), (2, 8, 32), dtype=jnp.float32)
    zo = jax.block_until_ready(softmax(z, dim=1))
    assert jnp.allclose(zo, jax.nn.softmax(z, axis=1), atol=2e-3, rtol=2e-3)

    print("KERNEL_OK")
</pallas_src>

<mosaic_0001>
module attributes {stable_mosaic.version = 11 : i64} {
  func.func @_softmax_mid_kernel(%arg0: i32, %arg1: i32, %arg2: memref<2x4x256xf32, #tpu.memory_space<vmem>>, %arg3: memref<2x4x256xf32, #tpu.memory_space<vmem>>) attributes {dimension_semantics = [#tpu.dimension_semantics<parallel>, #tpu.dimension_semantics<parallel>], iteration_bounds = array<i64: 1, 1>, scalar_prefetch = 0 : i64, scratch_operands = 0 : i64, tpu.core_type = #tpu.core_type<tc>, window_params = [{transform_indices = @transform_0, window_bounds = array<i64: 2, 4, 256>}, {transform_indices = @transform_1, window_bounds = array<i64: 2, 4, 256>}]} {
    %c0 = arith.constant 0 : index
    %c0_0 = arith.constant 0 : index
    %c0_1 = arith.constant 0 : index
    %0 = vector.load %arg2[%c0, %c0_0, %c0_1] : memref<2x4x256xf32, #tpu.memory_space<vmem>>, vector<2x4x256xf32>
    %cst = arith.constant dense<0xFF800000> : vector<2x256xf32>
    %1 = vector.multi_reduction <maximumf>, %0, %cst [1] : vector<2x4x256xf32> to vector<2x256xf32>
    %2 = vector.shape_cast %1 : vector<2x256xf32> to vector<2x1x256xf32>
    %3 = vector.broadcast %2 : vector<2x1x256xf32> to vector<2x4x256xf32>
    %4 = arith.subf %0, %3 : vector<2x4x256xf32>
    %5 = math.exp %4 : vector<2x4x256xf32>
    %cst_2 = arith.constant dense<0.000000e+00> : vector<2x256xf32>
    %6 = vector.multi_reduction <add>, %5, %cst_2 [1] : vector<2x4x256xf32> to vector<2x256xf32>
    %7 = vector.shape_cast %6 : vector<2x256xf32> to vector<2x1x256xf32>
    %8 = tpu.reciprocal %7 {approx = true} : vector<2x1x256xf32> -> vector<2x1x256xf32>
    %9 = vector.broadcast %8 : vector<2x1x256xf32> to vector<2x4x256xf32>
    %10 = arith.mulf %5, %9 : vector<2x4x256xf32>
    %c0_3 = arith.constant 0 : index
    %c0_4 = arith.constant 0 : index
    %c0_5 = arith.constant 0 : index
    %11 = vector.load %arg3[%c0_3, %c0_4, %c0_5] : memref<2x4x256xf32, #tpu.memory_space<vmem>>, vector<2x4x256xf32>
    tpu.vector_store %arg3[%c0_3, %c0_4, %c0_5], %10 {strides = array<i32>} : memref<2x4x256xf32, #tpu.memory_space<vmem>>, vector<2x4x256xf32>,
    return
  }
  func.func @transform_0(%arg0: i32, %arg1: i32) -> (i32, i32, i32) {
    %c0_i32 = arith.constant 0 : i32
    %c0_i32_0 = arith.constant 0 : i32
    return %arg0, %c0_i32, %arg1 : i32, i32, i32
  }
  func.func @transform_1(%arg0: i32, %arg1: i32) -> (i32, i32, i32) {
    %c0_i32 = arith.constant 0 : i32
    %c0_i32_0 = arith.constant 0 : i32
    return %arg0, %c0_i32, %arg1 : i32, i32, i32
  }
}

</mosaic_0001>

<bundles_post_ra>
// kernel: _softmax_middim.1
= control target key start
LH: loop header
LB: loop body
LE: loop exit
PB: predicated region body
PF: predicated region fallthrough
CT: control target
= control target key end

     0   :  { %6 = vsyncpa [#allocation3], 0  ;;  %s237_s0 = inlined_call_operand.hbm [shape: f32[2,4,256], index: 0, kind: input, shape index: {}]   ;;  %s238_s1 = inlined_call_operand.hbm [shape: f32[2,4,256], index: 1, kind: output, shape index: {}]  }
   0x1   :  { %7 = vsyncpa [#allocation4], 0  ;;  %s203_s6 = smov [#allocation2]  }
   0x2   :  { %s13_s7 = sshll.u32 %s203_s6, 4  ;;  %s14_s7 = int_to_ptr.vmem [resolvable:$true] %s13_s7 }
   0x3   :  { %s167_s8 = scalar_lea.vmem %s14_s7, 256  ;;  %p172_p1 = scmp.lt.s32.totalorder %s14_s7, %s14_s7 }
   0x4   :  { %p168_p0 = scmp.ne.s32.totalorder %s14_s7, %s167_s8  ;;  %p173_p2 = scmp.lt.s32.totalorder %s167_s8, %s167_s8 }
   0x6   :  { %p174_p3 = por %p173_p2, %p172_p1 }
   0x8   :  { %p175_p4 = pnand %p174_p3, %p168_p0 }
   0xa   :  { %178 = shalt.err (!%p175_p4)
}
   0xb   :  { %s204_s9 = smov 128   ;;  %s205_s10 = smov 8  }
   0xc   :  { %19 = dma.hbm_to_vmem [thread:$0]  %s237_s0, 256, %s14_s7, [#allocation3], %s204_s9, %s204_s9, %s205_s10  }
   0xd   :  { %199 = dma.done.wait [#allocation3], 256  }
   0xe   :  { %200 = vsyncadd [#allocation3], 4294967040  ;;  %vm31_vm0 = vcmask 1043456   ;;  %v23_v0 = vld [vmem:[#allocation2] sm:$0xff]  ;;  %v24_v1 = vld [vmem:[#allocation2 + $0x8] sm:$0xff]  ;;  %s206_s0 = smov [#allocation5]  }
   0xf   :  { %v27_v2 = vcombine.high %v23_v0, %v23_v0  ;;  %v32_v3 = vsel %vm31_vm0, %v23_v0, -inf  ;;  %v28_v4 = vcombine.high %v24_v1, %v24_v1  ;;  %v46_v5 = vsel %vm31_vm0, %v24_v1, -inf  ;;  %s129_s13 = sshll.u32 %s206_s0, 4  ;;  %s130_s13 = int_to_ptr.vmem [resolvable:$true] %s129_s13 }
  0x10   :  { %v33_v6 = vrot.slane %v32_v3, 4  ;;  %v47_v7 = vrot.slane %v46_v5, 4  ;;  %s179_s14 = scalar_lea.vmem %s130_s13, 256  ;;  %p184_p6 = scmp.lt.s32.totalorder %s130_s13, %s130_s13 }
  0x11   :  { %v39_v8 = vsel %vm31_vm0, %v27_v2, -inf  ;;  %v53_v9 = vsel %vm31_vm0, %v28_v4, -inf  ;;  %p180_p5 = scmp.ne.s32.totalorder %s130_s13, %s179_s14  ;;  %p185_p7 = scmp.lt.s32.totalorder %s179_s14, %s179_s14 }
  0x12   :  { %v34_v10 = vmax.f32 %v32_v3, %v33_v6  ;;  %v40_v11 = vrot.slane %v39_v8, 4  ;;  %v48_v12 = vmax.f32 %v46_v5, %v47_v7  ;;  %v54_v13 = vrot.slane %v53_v9, 4 }
  0x13   :  { %p186_p8 = por %p185_p7, %p184_p6 }
  0x14   :  { %v35_v14 = vrot.slane %v34_v10, 2  ;;  %v41_v15 = vmax.f32 %v39_v8, %v40_v11  ;;  %v49_v16 = vrot.slane %v48_v12, 2  ;;  %v55_v17 = vmax.f32 %v53_v9, %v54_v13 }
  0x15   :  { %p187_p9 = pnand %p186_p8, %p180_p5 }
  0x16   :  { %v36_v18 = vmax.f32 %v34_v10, %v35_v14  ;;  %v42_v19 = vrot.slane %v41_v15, 2  ;;  %v50_v20 = vmax.f32 %v48_v12, %v49_v16  ;;  %v56_v21 = vrot.slane %v55_v17, 2 }
  0x18   :  { %v37_v22 = vrot.slane %v36_v18, 1  ;;  %v43_v23 = vmax.f32 %v41_v15, %v42_v19  ;;  %v51_v24 = vrot.slane %v50_v20, 1  ;;  %v57_v25 = vmax.f32 %v55_v17, %v56_v21 }
  0x1a   :  { %v38_v26 = vmax.f32 %v36_v18, %v37_v22  ;;  %v44_v27 = vrot.slane %v43_v23, 1  ;;  %v52_v28 = vmax.f32 %v50_v20, %v51_v24  ;;  %v58_v29 = vrot.slane %v57_v25, 1 }
  0x1c   :  { %v45_v30 = vmax.f32 %v43_v23, %v44_v27  ;;  %v59_v31 = vmax.f32 %v57_v25, %v58_v29 }
  0x1e   :  { %v64_v32 = vcombine.low %v38_v26, %v45_v30  ;;  %v65_v33 = vcombine.low %v52_v28, %v59_v31 }
  0x20   :  { %v68_v34 = vsub.f32 %v23_v0, %v64_v32  ;;  %v69_v35 = vsub.f32 %v24_v1, %v65_v33 }
  0x22   :  { %v70_v36 = vmul.f32 1.442695, %v68_v34  ;;  %v72_v37 = vmul.f32 1.442695, %v69_v35 }
  0x24   :  { %147 = vpow2.f32 %v70_v36 }
  0x25   :  { %149 = vpow2.f32 %v72_v37 }
  0x31   :  { %v148_v38 = vpop.eup %147 }
  0x32   :  { %v150_v39 = vpop.eup %149  ;;  %v76_v40 = vcombine.high %v148_v38, %v148_v38  ;;  %v80_v41 = vsel %vm31_vm0, %v148_v38, 0.0 }
  0x33   :  { %v81_v42 = vrot.slane %v80_v41, 4  ;;  %v77_v43 = vcombine.high %v150_v39, %v150_v39  ;;  %v94_v44 = vsel %vm31_vm0, %v150_v39, 0.0 }
  0x34   :  { %v87_v45 = vsel %vm31_vm0, %v76_v40, 0.0  ;;  %v95_v46 = vrot.slane %v94_v44, 4 }
  0x35   :  { %v82_v47 = vadd.f32 %v81_v42, %v80_v41  ;;  %v88_v48 = vrot.slane %v87_v45, 4  ;;  %v101_v49 = vsel %vm31_vm0, %v77_v43, 0.0 }
  0x36   :  { %v96_v50 = vadd.f32 %v95_v46, %v94_v44  ;;  %v102_v51 = vrot.slane %v101_v49, 4 }
  0x37   :  { %v83_v52 = vrot.slane %v82_v47, 2  ;;  %v89_v53 = vadd.f32 %v88_v48, %v87_v45 }
  0x38   :  { %v97_v54 = vrot.slane %v96_v50, 2  ;;  %v103_v55 = vadd.f32 %v102_v51, %v101_v49 }
  0x39   :  { %v84_v56 = vadd.f32 %v83_v52, %v82_v47  ;;  %v90_v57 = vrot.slane %v89_v53, 2 }
  0x3a   :  { %v98_v58 = vadd.f32 %v97_v54, %v96_v50  ;;  %v104_v59 = vrot.slane %v103_v55, 2 }
  0x3b   :  { %v85_v60 = vrot.slane %v84_v56, 1  ;;  %v91_v61 = vadd.f32 %v90_v57, %v89_v53 }
  0x3c   :  { %v99_v62 = vrot.slane %v98_v58, 1  ;;  %v105_v63 = vadd.f32 %v104_v59, %v103_v55 }
  0x3d   :  { %v86_v0 = vadd.f32 %v85_v60, %v84_v56  ;;  %v92_v1 = vrot.slane %v91_v61, 1 }
  0x3e   :  { %v100_v2 = vadd.f32 %v99_v62, %v98_v58  ;;  %v106_v3 = vrot.slane %v105_v63, 1 }
  0x3f   :  { %v93_v4 = vadd.f32 %v92_v1, %v91_v61  ;;  %151 = vrcp.f32 %v86_v0 }
  0x40   :  { %v107_v5 = vadd.f32 %v106_v3, %v105_v63  ;;  %153 = vrcp.f32 %v100_v2 }
  0x41   :  { %155 = vrcp.f32 %v93_v4 }
  0x42   :  { %157 = vrcp.f32 %v107_v5 }
  0x4c   :  { %v152_v6 = vpop.eup %151 }
  0x4d   :  { %v154_v7 = vpop.eup %153 }
  0x4e   :  { %v156_v8 = vpop.eup %155 }
  0x4f   :  { %v158_v9 = vpop.eup %157  ;;  %v116_v10 = vcombine.low %v152_v6, %v156_v8 }
  0x50   :  { %v117_v11 = vcombine.low %v154_v7, %v158_v9 }
  0x51   :  { %v120_v12 = vmul.f32 %v148_v38, %v116_v10 }
  0x52   :  { %v121_v13 = vmul.f32 %v150_v39, %v117_v11 }
  0x53   :  { %122 = vst [vmem:[#allocation5] sm:$0xff] %v120_v12 }
  0x54   :  { %123 = vst [vmem:[#allocation5 + $0x8] sm:$0xff] %v121_v13 }
  0x55   :  { %190 = shalt.err (!%p187_p9)
}
  0x56   :  { %135 = dma.vmem_to_hbm [thread:$0]  %s130_s13, 256, %s238_s1, [#allocation4], %s204_s9, %s204_s9, %s205_s10  }
  0x57   :  { %201 = dma.done.wait [#allocation4], 256  }
  0x58   :  { %202 = vsyncadd [#allocation4], 4294967040 }
  0x59   :  { %139 = vsyncpa [#allocation3], 1 }
  0x5a   :  { %140 = vsyncpa [#allocation4], 1 }

</bundles_post_ra>
